<compile_context>
chip_gen: v7x
topology: tpu7x:2x2x1
jax: 0.10.0
libtpu: 0.0.40
codegen_flags: <defaults>
</compile_context>

<pallas_src>
import jax
import jax.numpy as jnp
from jax import lax
from jax.experimental import pallas as pl
from jax.experimental.pallas import tpu as pltpu


def _fused_cnn_linear_kernel(p_ref, wc_ref, bc_ref, wl_ref, bl_ref, o_ref):
    # p_ref:  (P*N, K*K*C)  im2col patches, rows ordered (p, n)
    # wc_ref: (K*K*C, O)    conv weight as a right-matmul operand
    # bc_ref: (1, O)        conv bias
    # wl_ref: (P, O, D)     linear weight, permuted to (p, o, d)
    # bl_ref: (1, D)        linear bias
    # o_ref:  (N, D)        final features
    n_out, d = o_ref.shape
    n_pos = wl_ref.shape[0]

    # ---- Conv2d(k=3, stride=2, pad=0) as one matmul + bias + ReLU (MXU) ----
    conv = jnp.dot(p_ref[...], wc_ref[...], preferred_element_type=jnp.float32)
    conv = jnp.maximum(conv + bc_ref[...], 0.0)          # (P*N, O), rows (p, n)

    # ---- Linear + ReLU fused in the same body: sum over output positions ----
    acc = jnp.zeros((n_out, d), jnp.float32)
    for p in range(n_pos):                               # unrolled, P is small
        conv_p = conv[p * n_out:(p + 1) * n_out, :]      # (N, O) aligned slice
        acc = acc + jnp.dot(conv_p, wl_ref[p],
                            preferred_element_type=jnp.float32)
    o_ref[...] = jnp.maximum(acc + bl_ref[...], 0.0)


def stacked_cnn_feature_extractor(x, conv_w, conv_b, lin_w, lin_b):
    """Pallas implementation of StackedCNNFeatureExtractor.forward.

    x:      (B, S, H, W, C) -- channel-last observations (C = embedding_dim)
    conv_w: (32, C, 3, 3)   -- PyTorch Conv2d weight layout (O, I, KH, KW)
    conv_b: (32,)
    lin_w:  (D, n_flatten)  -- PyTorch Linear weight layout
    lin_b:  (D,)
    returns (B, S, D) float32
    """
    x = x.astype(jnp.float32)
    B, S, H, W, C = x.shape
    K, stride = 3, 2
    Ho = (H - K) // stride + 1
    Wo = (W - K) // stride + 1
    P = Ho * Wo
    O = conv_w.shape[0]
    D = lin_w.shape[0]
    N = B * S
    KKC = K * K * C

    # ---- glue: im2col patch extraction (pure data rearrangement in XLA) ----
    # TODO(synk): in-kernel im2col (strided loads from a (H, W, C) block) is
    # possible but layout-risky at these tiny shapes; kept as XLA glue.
    xr = x.reshape(N, H, W, C)
    cols = []
    for kh in range(K):
        for kw in range(K):
            cols.append(xr[:, kh:kh + stride * Ho:stride,
                           kw:kw + stride * Wo:stride, :])       # (N, Ho, Wo, C)
    patches = jnp.stack(cols, axis=3).reshape(N, P, KKC)         # (kh, kw, c)
    patches = jnp.transpose(patches, (1, 0, 2)).reshape(P * N, KKC)  # rows (p,n)

    # conv weight (O, C, KH, KW) -> (KH, KW, C, O) -> (K*K*C, O)
    wc = jnp.transpose(conv_w, (2, 3, 1, 0)).reshape(KKC, O).astype(jnp.float32)
    bc = conv_b.reshape(1, O).astype(jnp.float32)

    # linear weight: PyTorch flatten order is (c, oh, ow) == (o, p);
    # re-lay as (p, o, d) so the kernel contracts per output position p.
    wl = jnp.transpose(lin_w.reshape(D, O, P), (2, 1, 0)).astype(jnp.float32)
    bl = lin_b.reshape(1, D).astype(jnp.float32)

    flops = 2 * (P * N) * KKC * O + 2 * N * (P * O) * D
    bytes_accessed = 4 * (P * N * KKC + KKC * O + O + P * O * D + D + N * D)

    out = pl.pallas_call(
        _fused_cnn_linear_kernel,
        out_shape=jax.ShapeDtypeStruct((N, D), jnp.float32),
        grid=(1,),
        in_specs=[
            pl.BlockSpec((P * N, KKC), lambda i: (0, 0)),
            pl.BlockSpec((KKC, O), lambda i: (0, 0)),
            pl.BlockSpec((1, O), lambda i: (0, 0)),
            pl.BlockSpec((P, O, D), lambda i: (0, 0, 0)),
            pl.BlockSpec((1, D), lambda i: (0, 0)),
        ],
        out_specs=pl.BlockSpec((N, D), lambda i: (0, 0)),
        compiler_params=pltpu.CompilerParams(
            dimension_semantics=("arbitrary",)),
        cost_estimate=pl.CostEstimate(flops=flops, transcendentals=0,
                                      bytes_accessed=bytes_accessed),
    )(patches, wc, bc, wl, bl)

    return out.reshape(B, S, D)


def _reference(x, conv_w, conv_b, lin_w, lin_b):
    """Pure-JAX reference mirroring the PyTorch module."""
    x = x.astype(jnp.float32)
    B, S, H, W, C = x.shape
    O = conv_w.shape[0]
    D = lin_w.shape[0]
    xr = x.reshape(B * S, H, W, C)
    w_hwio = jnp.transpose(conv_w, (2, 3, 1, 0)).astype(jnp.float32)
    conv = lax.conv_general_dilated(
        xr, w_hwio, window_strides=(2, 2), padding="VALID",
        dimension_numbers=("NHWC", "HWIO", "NHWC"))
    conv = jnp.maximum(conv + conv_b.reshape(1, 1, 1, O), 0.0)
    flat = jnp.transpose(conv, (0, 3, 1, 2)).reshape(B * S, -1)   # NCHW flatten
    out = jnp.maximum(flat @ lin_w.T.astype(jnp.float32)
                      + lin_b.astype(jnp.float32), 0.0)
    return out.reshape(B, S, D)


if __name__ == "__main__":
    B, S, H, W = 2, 4, 9, 9
    embedding_dim = 4      # channels (last axis of x)
    cnn_output_dim = 32
    K, stride, O = 3, 2, 32
    Ho = (H - K) // stride + 1
    Wo = (W - K) // stride + 1
    n_flatten = O * Ho * Wo

    key = jax.random.PRNGKey(0)
    kx, kcw, kcb, klw, klb = jax.random.split(key, 5)
    x = jax.random.uniform(kx, (B, S, H, W, embedding_dim), jnp.float32)
    conv_w = 0.1 * jax.random.normal(kcw, (O, embedding_dim, K, K), jnp.float32)
    conv_b = 0.1 * jax.random.normal(kcb, (O,), jnp.float32)
    lin_w = 0.05 * jax.random.normal(klw, (cnn_output_dim, n_flatten), jnp.float32)
    lin_b = 0.05 * jax.random.normal(klb, (cnn_output_dim,), jnp.float32)

    out = stacked_cnn_feature_extractor(x, conv_w, conv_b, lin_w, lin_b)
    out = jax.block_until_ready(out)

    ref = _reference(x, conv_w, conv_b, lin_w, lin_b)
    assert out.shape == (B, S, cnn_output_dim), out.shape
    assert jnp.allclose(out, ref, atol=1e-4, rtol=1e-4), float(
        jnp.max(jnp.abs(out - ref)))
    print("KERNEL_OK")
</pallas_src>

<mosaic_0001>
module attributes {stable_mosaic.version = 11 : i64} {
  func.func @_fused_cnn_linear_kernel(%arg0: i32, %arg1: memref<128x36xf32, #tpu.memory_space<vmem>>, %arg2: memref<36x32xf32, #tpu.memory_space<vmem>>, %arg3: memref<1x32xf32, #tpu.memory_space<vmem>>, %arg4: memref<16x32x32xf32, #tpu.memory_space<vmem>>, %arg5: memref<1x32xf32, #tpu.memory_space<vmem>>, %arg6: memref<8x32xf32, #tpu.memory_space<vmem>>) attributes {dimension_semantics = [#tpu.dimension_semantics<arbitrary>], iteration_bounds = array<i64: 1>, scalar_prefetch = 0 : i64, scratch_operands = 0 : i64, tpu.core_type = #tpu.core_type<tc>, window_params = [{pipeline_mode = #tpu.pipeline_mode<synchronous>, transform_indices = @transform_0, window_bounds = array<i64: 128, 36>}, {pipeline_mode = #tpu.pipeline_mode<synchronous>, transform_indices = @transform_1, window_bounds = array<i64: 36, 32>}, {pipeline_mode = #tpu.pipeline_mode<synchronous>, transform_indices = @transform_2, window_bounds = array<i64: 1, 32>}, {pipeline_mode = #tpu.pipeline_mode<synchronous>, transform_indices = @transform_3, window_bounds = array<i64: 16, 32, 32>}, {pipeline_mode = #tpu.pipeline_mode<synchronous>, transform_indices = @transform_4, window_bounds = array<i64: 1, 32>}, {pipeline_mode = #tpu.pipeline_mode<synchronous>, transform_indices = @transform_5, window_bounds = array<i64: 8, 32>}]} {
    %c0 = arith.constant 0 : index
    %c0_0 = arith.constant 0 : index
    %0 = vector.load %arg1[%c0, %c0_0] : memref<128x36xf32, #tpu.memory_space<vmem>>, vector<128x36xf32>
    %c0_1 = arith.constant 0 : index
    %c0_2 = arith.constant 0 : index
    %1 = vector.load %arg2[%c0_1, %c0_2] : memref<36x32xf32, #tpu.memory_space<vmem>>, vector<36x32xf32>
    %cst = arith.constant dense<0.000000e+00> : vector<128x32xf32>
    %2 = tpu.matmul %0, %1, %cst {dimension_numbers = #tpu.dot_dimension_numbers<[1], [0], [0], [1], [0, 0, 1, 1], [], []>} : vector<128x36xf32>, vector<36x32xf32>, vector<128x32xf32> -> vector<128x32xf32>
    %c0_3 = arith.constant 0 : index
    %c0_4 = arith.constant 0 : index
    %3 = vector.load %arg3[%c0_3, %c0_4] : memref<1x32xf32, #tpu.memory_space<vmem>>, vector<1x32xf32>
    %4 = vector.broadcast %3 : vector<1x32xf32> to vector<128x32xf32>
    %5 = arith.addf %2, %4 : vector<128x32xf32>
    %cst_5 = arith.constant 0.000000e+00 : f32
    %6 = vector.broadcast %cst_5 : f32 to vector<128x32xf32>
    %7 = arith.maximumf %5, %6 : vector<128x32xf32>
    %cst_6 = arith.constant 0.000000e+00 : f32
    %8 = vector.broadcast %cst_6 : f32 to vector<8x32xf32>
    %9 = vector.extract_strided_slice %7 {offsets = [0, 0], sizes = [8, 32], strides = [1, 1]} : vector<128x32xf32> to vector<8x32xf32>
    %c0_7 = arith.constant 0 : index
    %c0_8 = arith.constant 0 : index
    %c0_9 = arith.constant 0 : index
    %10 = vector.load %arg4[%c0_7, %c0_8, %c0_9] : memref<16x32x32xf32, #tpu.memory_space<vmem>>, vector<1x32x32xf32>
    %11 = vector.shape_cast %10 : vector<1x32x32xf32> to vector<32x32xf32>
    %cst_10 = arith.constant dense<0.000000e+00> : vector<8x32xf32>
    %12 = tpu.matmul %9, %11, %cst_10 {dimension_numbers = #tpu.dot_dimension_numbers<[1], [0], [0], [1], [0, 0, 1, 1], [], []>} : vector<8x32xf32>, vector<32x32xf32>, vector<8x32xf32> -> vector<8x32xf32>
    %13 = arith.addf %8, %12 : vector<8x32xf32>
    %14 = vector.extract_strided_slice %7 {offsets = [8, 0], sizes = [8, 32], strides = [1, 1]} : vector<128x32xf32> to vector<8x32xf32>
    %c1 = arith.constant 1 : index
    %c0_11 = arith.constant 0 : index
    %c0_12 = arith.constant 0 : index
    %15 = vector.load %arg4[%c1, %c0_11, %c0_12] : memref<16x32x32xf32, #tpu.memory_space<vmem>>, vector<1x32x32xf32>
    %16 = vector.shape_cast %15 : vector<1x32x32xf32> to vector<32x32xf32>
    %cst_13 = arith.constant dense<0.000000e+00> : vector<8x32xf32>
    %17 = tpu.matmul %14, %16, %cst_13 {dimension_numbers = #tpu.dot_dimension_numbers<[1], [0], [0], [1], [0, 0, 1, 1], [], []>} : vector<8x32xf32>, vector<32x32xf32>, vector<8x32xf32> -> vector<8x32xf32>
    %18 = arith.addf %13, %17 : vector<8x32xf32>
    %19 = vector.extract_strided_slice %7 {offsets = [16, 0], sizes = [8, 32], strides = [1, 1]} : vector<128x32xf32> to vector<8x32xf32>
    %c2 = arith.constant 2 : index
    %c0_14 = arith.constant 0 : index
    %c0_15 = arith.constant 0 : index
    %20 = vector.load %arg4[%c2, %c0_14, %c0_15] : memref<16x32x32xf32, #tpu.memory_space<vmem>>, vector<1x32x32xf32>
    %21 = vector.shape_cast %20 : vector<1x32x32xf32> to vector<32x32xf32>
    %cst_16 = arith.constant dense<0.000000e+00> : vector<8x32xf32>
    %22 = tpu.matmul %19, %21, %cst_16 {dimension_numbers = #tpu.dot_dimension_numbers<[1], [0], [0], [1], [0, 0, 1, 1], [], []>} : vector<8x32xf32>, vector<32x32xf32>, vector<8x32xf32> -> vector<8x32xf32>
    %23 = arith.addf %18, %22 : vector<8x32xf32>
    %24 = vector.extract_strided_slice %7 {offsets = [24, 0], sizes = [8, 32], strides = [1, 1]} : vector<128x32xf32> to vector<8x32xf32>
    %c3 = arith.constant 3 : index
    %c0_17 = arith.constant 0 : index
    %c0_18 = arith.constant 0 : index
    %25 = vector.load %arg4[%c3, %c0_17, %c0_18] : memref<16x32x32xf32, #tpu.memory_space<vmem>>, vector<1x32x32xf32>
    %26 = vector.shape_cast %25 : vector<1x32x32xf32> to vector<32x32xf32>
    %cst_19 = arith.constant dense<0.000000e+00> : vector<8x32xf32>
    %27 = tpu.matmul %24, %26, %cst_19 {dimension_numbers = #tpu.dot_dimension_numbers<[1], [0], [0], [1], [0, 0, 1, 1], [], []>} : vector<8x32xf32>, vector<32x32xf32>, vector<8x32xf32> -> vector<8x32xf32>
    %28 = arith.addf %23, %27 : vector<8x32xf32>
    %29 = vector.extract_strided_slice %7 {offsets = [32, 0], sizes = [8, 32], strides = [1, 1]} : vector<128x32xf32> to vector<8x32xf32>
    %c4 = arith.constant 4 : index
    %c0_20 = arith.constant 0 : index
    %c0_21 = arith.constant 0 : index
    %30 = vector.load %arg4[%c4, %c0_20, %c0_21] : memref<16x32x32xf32, #tpu.memory_space<vmem>>, vector<1x32x32xf32>
    %31 = vector.shape_cast %30 : vector<1x32x32xf32> to vector<32x32xf32>
    %cst_22 = arith.constant dense<0.000000e+00> : vector<8x32xf32>
    %32 = tpu.matmul %29, %31, %cst_22 {dimension_numbers = #tpu.dot_dimension_numbers<[1], [0], [0], [1], [0, 0, 1, 1], [], []>} : vector<8x32xf32>, vector<32x32xf32>, vector<8x32xf32> -> vector<8x32xf32>
    %33 = arith.addf %28, %32 : vector<8x32xf32>
    %34 = vector.extract_strided_slice %7 {offsets = [40, 0], sizes = [8, 32], strides = [1, 1]} : vector<128x32xf32> to vector<8x32xf32>
    %c5 = arith.constant 5 : index
    %c0_23 = arith.constant 0 : index
    %c0_24 = arith.constant 0 : index
    %35 = vector.load %arg4[%c5, %c0_23, %c0_24] : memref<16x32x32xf32, #tpu.memory_space<vmem>>, vector<1x32x32xf32>
    %36 = vector.shape_cast %35 : vector<1x32x32xf32> to vector<32x32xf32>
    %cst_25 = arith.constant dense<0.000000e+00> : vector<8x32xf32>
    %37 = tpu.matmul %34, %36, %cst_25 {dimension_numbers = #tpu.dot_dimension_numbers<[1], [0], [0], [1], [0, 0, 1, 1], [], []>} : vector<8x32xf32>, vector<32x32xf32>, vector<8x32xf32> -> vector<8x32xf32>
    %38 = arith.addf %33, %37 : vector<8x32xf32>
    %39 = vector.extract_strided_slice %7 {offsets = [48, 0], sizes = [8, 32], strides = [1, 1]} : vector<128x32xf32> to vector<8x32xf32>
    %c6 = arith.constant 6 : index
    %c0_26 = arith.constant 0 : index
    %c0_27 = arith.constant 0 : index
    %40 = vector.load %arg4[%c6, %c0_26, %c0_27] : memref<16x32x32xf32, #tpu.memory_space<vmem>>, vector<1x32x32xf32>
    %41 = vector.shape_cast %40 : vector<1x32x32xf32> to vector<32x32xf32>
    %cst_28 = arith.constant dense<0.000000e+00> : vector<8x32xf32>
    %42 = tpu.matmul %39, %41, %cst_28 {dimension_numbers = #tpu.dot_dimension_numbers<[1], [0], [0], [1], [0, 0, 1, 1], [], []>} : vector<8x32xf32>, vector<32x32xf32>, vector<8x32xf32> -> vector<8x32xf32>
    %43 = arith.addf %38, %42 : vector<8x32xf32>
    %44 = vector.extract_strided_slice %7 {offsets = [56, 0], sizes = [8, 32], strides = [1, 1]} : vector<128x32xf32> to vector<8x32xf32>
    %c7 = arith.constant 7 : index
    %c0_29 = arith.constant 0 : index
    %c0_30 = arith.constant 0 : index
    %45 = vector.load %arg4[%c7, %c0_29, %c0_30] : memref<16x32x32xf32, #tpu.memory_space<vmem>>, vector<1x32x32xf32>
    %46 = vector.shape_cast %45 : vector<1x32x32xf32> to vector<32x32xf32>
    %cst_31 = arith.constant dense<0.000000e+00> : vector<8x32xf32>
    %47 = tpu.matmul %44, %46, %cst_31 {dimension_numbers = #tpu.dot_dimension_numbers<[1], [0], [0], [1], [0, 0, 1, 1], [], []>} : vector<8x32xf32>, vector<32x32xf32>, vector<8x32xf32> -> vector<8x32xf32>
    %48 = arith.addf %43, %47 : vector<8x32xf32>
    %49 = vector.extract_strided_slice %7 {offsets = [64, 0], sizes = [8, 32], strides = [1, 1]} : vector<128x32xf32> to vector<8x32xf32>
    %c8 = arith.constant 8 : index
    %c0_32 = arith.constant 0 : index
    %c0_33 = arith.constant 0 : index
    %50 = vector.load %arg4[%c8, %c0_32, %c0_33] : memref<16x32x32xf32, #tpu.memory_space<vmem>>, vector<1x32x32xf32>
    %51 = vector.shape_cast %50 : vector<1x32x32xf32> to vector<32x32xf32>
    %cst_34 = arith.constant dense<0.000000e+00> : vector<8x32xf32>
    %52 = tpu.matmul %49, %51, %cst_34 {dimension_numbers = #tpu.dot_dimension_numbers<[1], [0], [0], [1], [0, 0, 1, 1], [], []>} : vector<8x32xf32>, vector<32x32xf32>, vector<8x32xf32> -> vector<8x32xf32>
    %53 = arith.addf %48, %52 : vector<8x32xf32>
    %54 = vector.extract_strided_slice %7 {offsets = [72, 0], sizes = [8, 32], strides = [1, 1]} : vector<128x32xf32> to vector<8x32xf32>
    %c9 = arith.constant 9 : index
    %c0_35 = arith.constant 0 : index
    %c0_36 = arith.constant 0 : index
    %55 = vector.load %arg4[%c9, %c0_35, %c0_36] : memref<16x32x32xf32, #tpu.memory_space<vmem>>, vector<1x32x32xf32>
    %56 = vector.shape_cast %55 : vector<1x32x32xf32> to vector<32x32xf32>
    %cst_37 = arith.constant dense<0.000000e+00> : vector<8x32xf32>
    %57 = tpu.matmul %54, %56, %cst_37 {dimension_numbers = #tpu.dot_dimension_numbers<[1], [0], [0], [1], [0, 0, 1, 1], [], []>} : vector<8x32xf32>, vector<32x32xf32>, vector<8x32xf32> -> vector<8x32xf32>
    %58 = arith.addf %53, %57 : vector<8x32xf32>
    %59 = vector.extract_strided_slice %7 {offsets = [80, 0], sizes = [8, 32], strides = [1, 1]} : vector<128x32xf32> to vector<8x32xf32>
    %c10 = arith.constant 10 : index
    %c0_38 = arith.constant 0 : index
    %c0_39 = arith.constant 0 : index
    %60 = vector.load %arg4[%c10, %c0_38, %c0_39] : memref<16x32x32xf32, #tpu.memory_space<vmem>>, vector<1x32x32xf32>
    %61 = vector.shape_cast %60 : vector<1x32x32xf32> to vector<32x32xf32>
    %cst_40 = arith.constant dense<0.000000e+00> : vector<8x32xf32>
    %62 = tpu.matmul %59, %61, %cst_40 {dimension_numbers = #tpu.dot_dimension_numbers<[1], [0], [0], [1], [0, 0, 1, 1], [], []>} : vector<8x32xf32>, vector<32x32xf32>, vector<8x32xf32> -> vector<8x32xf32>
    %63 = arith.addf %58, %62 : vector<8x32xf32>
    %64 = vector.extract_strided_slice %7 {offsets = [88, 0], sizes = [8, 32], strides = [1, 1]} : vector<128x32xf32> to vector<8x32xf32>
    %c11 = arith.constant 11 : index
    %c0_41 = arith.constant 0 : index
    %c0_42 = arith.constant 0 : index
    %65 = vector.load %arg4[%c11, %c0_41, %c0_42] : memref<16x32x32xf32, #tpu.memory_space<vmem>>, vector<1x32x32xf32>
    %66 = vector.shape_cast %65 : vector<1x32x32xf32> to vector<32x32xf32>
    %cst_43 = arith.constant dense<0.000000e+00> : vector<8x32xf32>
    %67 = tpu.matmul %64, %66, %cst_43 {dimension_numbers = #tpu.dot_dimension_numbers<[1], [0], [0], [1], [0, 0, 1, 1], [], []>} : vector<8x32xf32>, vector<32x32xf32>, vector<8x32xf32> -> vector<8x32xf32>
    %68 = arith.addf %63, %67 : vector<8x32xf32>
    %69 = vector.extract_strided_slice %7 {offsets = [96, 0], sizes = [8, 32], strides = [1, 1]} : vector<128x32xf32> to vector<8x32xf32>
    %c12 = arith.constant 12 : index
    %c0_44 = arith.constant 0 : index
    %c0_45 = arith.constant 0 : index
    %70 = vector.load %arg4[%c12, %c0_44, %c0_45] : memref<16x32x32xf32, #tpu.memory_space<vmem>>, vector<1x32x32xf32>
    %71 = vector.shape_cast %70 : vector<1x32x32xf32> to vector<32x32xf32>
    %cst_46 = arith.constant dense<0.000000e+00> : vector<8x32xf32>
    %72 = tpu.matmul %69, %71, %cst_46 {dimension_numbers = #tpu.dot_dimension_numbers<[1], [0], [0], [1], [0, 0, 1, 1], [], []>} : vector<8x32xf32>, vector<32x32xf32>, vector<8x32xf32> -> vector<8x32xf32>
    %73 = arith.addf %68, %72 : vector<8x32xf32>
    %74 = vector.extract_strided_slice %7 {offsets = [104, 0], sizes = [8, 32], strides = [1, 1]} : vector<128x32xf32> to vector<8x32xf32>
    %c13 = arith.constant 13 : index
    %c0_47 = arith.constant 0 : index
    %c0_48 = arith.constant 0 : index
    %75 = vector.load %arg4[%c13, %c0_47, %c0_48] : memref<16x32x32xf32, #tpu.memory_space<vmem>>, vector<1x32x32xf32>
    %76 = vector.shape_cast %75 : vector<1x32x32xf32> to vector<32x32xf32>
    %cst_49 = arith.constant dense<0.000000e+00> : vector<8x32xf32>
    %77 = tpu.matmul %74, %76, %cst_49 {dimension_numbers = #tpu.dot_dimension_numbers<[1], [0], [0], [1], [0, 0, 1, 1], [], []>} : vector<8x32xf32>, vector<32x32xf32>, vector<8x32xf32> -> vector<8x32xf32>
    %78 = arith.addf %73, %77 : vector<8x32xf32>
    %79 = vector.extract_strided_slice %7 {offsets = [112, 0], sizes = [8, 32], strides = [1, 1]} : vector<128x32xf32> to vector<8x32xf32>
    %c14 = arith.constant 14 : index
    %c0_50 = arith.constant 0 : index
    %c0_51 = arith.constant 0 : index
    %80 = vector.load %arg4[%c14, %c0_50, %c0_51] : memref<16x32x32xf32, #tpu.memory_space<vmem>>, vector<1x32x32xf32>
    %81 = vector.shape_cast %80 : vector<1x32x32xf32> to vector<32x32xf32>
    %cst_52 = arith.constant dense<0.000000e+00> : vector<8x32xf32>
    %82 = tpu.matmul %79, %81, %cst_52 {dimension_numbers = #tpu.dot_dimension_numbers<[1], [0], [0], [1], [0, 0, 1, 1], [], []>} : vector<8x32xf32>, vector<32x32xf32>, vector<8x32xf32> -> vector<8x32xf32>
    %83 = arith.addf %78, %82 : vector<8x32xf32>
    %84 = vector.extract_strided_slice %7 {offsets = [120, 0], sizes = [8, 32], strides = [1, 1]} : vector<128x32xf32> to vector<8x32xf32>
    %c15 = arith.constant 15 : index
    %c0_53 = arith.constant 0 : index
    %c0_54 = arith.constant 0 : index
    %85 = vector.load %arg4[%c15, %c0_53, %c0_54] : memref<16x32x32xf32, #tpu.memory_space<vmem>>, vector<1x32x32xf32>
    %86 = vector.shape_cast %85 : vector<1x32x32xf32> to vector<32x32xf32>
    %cst_55 = arith.constant dense<0.000000e+00> : vector<8x32xf32>
    %87 = tpu.matmul %84, %86, %cst_55 {dimension_numbers = #tpu.dot_dimension_numbers<[1], [0], [0], [1], [0, 0, 1, 1], [], []>} : vector<8x32xf32>, vector<32x32xf32>, vector<8x32xf32> -> vector<8x32xf32>
    %88 = arith.addf %83, %87 : vector<8x32xf32>
    %c0_56 = arith.constant 0 : index
    %c0_57 = arith.constant 0 : index
    %89 = vector.load %arg5[%c0_56, %c0_57] : memref<1x32xf32, #tpu.memory_space<vmem>>, vector<1x32xf32>
    %90 = vector.broadcast %89 : vector<1x32xf32> to vector<8x32xf32>
    %91 = arith.addf %88, %90 : vector<8x32xf32>
    %cst_58 = arith.constant 0.000000e+00 : f32
    %92 = vector.broadcast %cst_58 : f32 to vector<8x32xf32>
    %93 = arith.maximumf %91, %92 : vector<8x32xf32>
    %c0_59 = arith.constant 0 : index
    %c0_60 = arith.constant 0 : index
    %94 = vector.load %arg6[%c0_59, %c0_60] : memref<8x32xf32, #tpu.memory_space<vmem>>, vector<8x32xf32>
    tpu.vector_store %arg6[%c0_59, %c0_60], %93 {strides = array<i32>} : memref<8x32xf32, #tpu.memory_space<vmem>>, vector<8x32xf32>,
    return
  }
  func.func @transform_0(%arg0: i32) -> (i32, i32) {
    %c0_i32 = arith.constant 0 : i32
    %c0_i32_0 = arith.constant 0 : i32
    %c0_i32_1 = arith.constant 0 : i32
    return %c0_i32, %c0_i32_0 : i32, i32
  }
  func.func @transform_1(%arg0: i32) -> (i32, i32) {
    %c0_i32 = arith.constant 0 : i32
    %c0_i32_0 = arith.constant 0 : i32
    %c0_i32_1 = arith.constant 0 : i32
    return %c0_i32, %c0_i32_0 : i32, i32
  }
  func.func @transform_2(%arg0: i32) -> (i32, i32) {
    %c0_i32 = arith.constant 0 : i32
    %c0_i32_0 = arith.constant 0 : i32
    %c0_i32_1 = arith.constant 0 : i32
    return %c0_i32, %c0_i32_0 : i32, i32
  }
  func.func @transform_3(%arg0: i32) -> (i32, i32, i32) {
    %c0_i32 = arith.constant 0 : i32
    %c0_i32_0 = arith.constant 0 : i32
    %c0_i32_1 = arith.constant 0 : i32
    %c0_i32_2 = arith.constant 0 : i32
    return %c0_i32, %c0_i32_0, %c0_i32_1 : i32, i32, i32
  }
  func.func @transform_4(%arg0: i32) -> (i32, i32) {
    %c0_i32 = arith.constant 0 : i32
    %c0_i32_0 = arith.constant 0 : i32
    %c0_i32_1 = arith.constant 0 : i32
    return %c0_i32, %c0_i32_0 : i32, i32
  }
  func.func @transform_5(%arg0: i32) -> (i32, i32) {
    %c0_i32 = arith.constant 0 : i32
    %c0_i32_0 = arith.constant 0 : i32
    %c0_i32_1 = arith.constant 0 : i32
    return %c0_i32, %c0_i32_0 : i32, i32
  }
}

</mosaic_0001>

<bundles_post_ra>
// kernel: tpu_custom_call.1
= control target key start
LH: loop header
LB: loop body
LE: loop exit
PB: predicated region body
PF: predicated region fallthrough
CT: control target
= control target key end

     0   :  { %10 = vsyncpa [#allocation3], 0  ;;  %s2338_s0 = inlined_call_operand.vmem [shape: f32[128,36], index: 0, kind: input, shape index: {}]   ;;  %s2339_s1 = inlined_call_operand.vmem [shape: f32[36,32], index: 1, kind: input, shape index: {}]   ;;  %s2340_s2 = inlined_call_operand.vmem [shape: f32[1,32], index: 2, kind: input, shape index: {}]   ;;  %s2341_s3 = inlined_call_operand.hbm [shape: f32[16,32,32], index: 3, kind: input, shape index: {}]   ;;  %s2342_s4 = inlined_call_operand.vmem [shape: f32[1,32], index: 4, kind: input, shape index: {}]   ;;  %s2343_s5 = inlined_call_operand.hbm [shape: f32[8,32], index: 5, kind: output, shape index: {}]  }
   0x1   :  { %11 = vsyncpa [#allocation4], 0  ;;  %s2069_s18 = smov [#allocation2]   ;;  %s2021_s22 = scalar_lea.hbm %s2341_s3, 8192 }
   0x2   :  { %s23_s19 = sshll.u32 %s2069_s18, 4  ;;  %p2022_p0 = scmp.ne.s32.totalorder %s2341_s3, %s2021_s22  ;;  %s24_s19 = int_to_ptr.vmem [resolvable:$true] %s23_s19 }
   0x3   :  { %p2025_p1 = scmp.lt.u32.totalorder %s2021_s22, %s2341_s3 }
   0x5   :  { %p2027_p2 = pnand %p2025_p1, %p2022_p0 }
   0x7   :  { %2030 = shalt.err (!%p2027_p2)
}
   0x8   :  { %s2031_s27 = scalar_lea.vmem %s24_s19, 8192  ;;  %p2036_p4 = scmp.lt.s32.totalorder %s24_s19, %s24_s19 }
   0x9   :  { %p2032_p3 = scmp.ne.s32.totalorder %s24_s19, %s2031_s27  ;;  %p2037_p5 = scmp.lt.s32.totalorder %s2031_s27, %s2031_s27 }
   0xb   :  { %p2038_p6 = por %p2037_p5, %p2036_p4 }
   0xd   :  { %p2039_p7 = pnand %p2038_p6, %p2032_p3 }
   0xf   :  { %2042 = shalt.err (!%p2039_p7)
}
  0x10   :  { %s2070_s28 = smov 128   ;;  %s2071_s29 = smov 8  }
  0x11   :  { %29 = dma.hbm_to_vmem [thread:$0]  %s2341_s3, 8192, %s24_s19, [#allocation3], %s2070_s28, %s2070_s28, %s2071_s29  }
  0x12   :  { %2065 = dma.done.wait [#allocation3], 8192  }
  0x13   :  { %2066 = vsyncadd [#allocation3], 4294959104  ;;  %v2072_v0 = vmov 0.0|0.0   ;;  %vm63_vm0 = vcmask 293888   ;;  %v51_v1 = vld [vmem:[%s2339_s1] sm:$0xff]  ;;  %v52_v2 = vld [vmem:[%s2339_s1 + $0x8] sm:$0xff] }
  0x14   :  { %1918 = vmatprep.subr.bf16.mxu1 %v2072_v0  ;;  %v53_v3 = vld [vmem:[%s2339_s1 + $0x10] sm:$0xff]  ;;  %v1910_v4 = vpack.c.bf16 %v52_v2, %v51_v1  ;;  %v54_v5 = vld [vmem:[%s2339_s1 + $0x18] sm:$0xff]  ;;  %v35_v6 = vld [vmem:[%s2338_s0] sm:$0xff]  ;;  %vm112_vm1 = vcmask 1043456   ;;  %vm2073_vm2 = vmmov 0   ;;  %v2074_v30 = vmov 0.0  }
  0x15   :  { %v1914_v7 = vpack.c.bf16 %v54_v5, %v53_v3  ;;  %1710 = vmatprep.mubr.msk.f32.mxu0 %vm63_vm0, %v35_v6  ;;  %v55_v8 = vld [vmem:[%s2339_s1 + $0x20] sm:$0xf]  ;;  %v283_v10 = vld [vmem:[#allocation2 + $0x28] sm:$0xff]  ;;  %v37_v13 = vld [vmem:[%s2338_s0 + $0x10] sm:$0xff]  ;;  %1742 = vmatprep.mubr.msk.f32.mxu1 %vm2073_vm2, %v2074_v30  ;;  %vm286_vm3 = vcmask 261120   ;;  %s2075_s22 = smov [#allocation5]  }
  0x16   :  { %1911 = vmatprep.subr.bf16.mxu0 %v1910_v4  ;;  %v282_v9 = vld [vmem:[#allocation2 + $0x20] sm:$0xff]  ;;  %v36_v12 = vld [vmem:[%s2338_s0 + $0x8] sm:$0xff]  ;;  %v38_v14 = vld [vmem:[%s2338_s0 + $0x18] sm:$0xff]  ;;  %s1555_s23 = sshll.u32 %s2075_s22, 4  ;;  %s1556_s23 = int_to_ptr.vmem [resolvable:$true] %s1555_s23 }
  0x17   :  { %1913 = vmatpush3.bf16.msra.mxu0 %v1910_v4  ;;  %v1919_v11 = vpack.c.bf16 %v283_v10, %v282_v9  ;;  %v39_v15 = vld [vmem:[%s2338_s0 + $0x20] sm:$0xff]  ;;  %v40_v16 = vld [vmem:[%s2338_s0 + $0x28] sm:$0xff]  ;;  %v41_v17 = vld [vmem:[%s2338_s0 + $0x30] sm:$0xff]  ;;  %s2043_s24 = scalar_lea.vmem %s1556_s23, 128  ;;  %p2048_p9 = scmp.lt.s32.totalorder %s1556_s23, %s1556_s23 }
  0x18   :  { %1915 = vmatprep.subr.bf16.mxu0 %v1914_v7  ;;  %v42_v18 = vld [vmem:[%s2338_s0 + $0x38] sm:$0xff]  ;;  %v43_v19 = vld [vmem:[%s2338_s0 + $0x40] sm:$0xff]  ;;  %v44_v20 = vld [vmem:[%s2338_s0 + $0x48] sm:$0xff]  ;;  %p2044_p8 = scmp.ne.s32.totalorder %s1556_s23, %s2043_s24  ;;  %p2049_p10 = scmp.lt.s32.totalorder %s2043_s24, %s2043_s24 }
  0x19   :  { %1920 = vmatpush3.bf16.msra.mxu1 %v1919_v11  ;;  %v45_v21 = vld [vmem:[%s2338_s0 + $0x50] sm:$0xff]  ;;  %v46_v22 = vld [vmem:[%s2338_s0 + $0x58] sm:$0xff]  ;;  %v47_v23 = vld [vmem:[%s2338_s0 + $0x60] sm:$0xff] }
  0x1a   :  { %1921 = vmatprep.subr.bf16.mxu1 %v2072_v0  ;;  %v48_v24 = vld [vmem:[%s2338_s0 + $0x68] sm:$0xff]  ;;  %v49_v25 = vld [vmem:[%s2338_s0 + $0x70] sm:$0xff]  ;;  %v50_v26 = vld [vmem:[%s2338_s0 + $0x78] sm:$0xff]  ;;  %p2050_p11 = por %p2049_p10, %p2048_p9 }
  0x1b   :  { %1917 = vmatpush3.bf16.msra.mxu0 %v1914_v7  ;;  %v284_v27 = vld [vmem:[#allocation2 + $0x30] sm:$0xff]  ;;  %v285_v28 = vld [vmem:[#allocation2 + $0x38] sm:$0xff]  ;;  %v671_v31 = vld [vmem:[#allocation2 + $0xa0] sm:$0xff] }
  0x1c   :  { %1708 = vmatprep.subr.msk.mxu0 %vm112_vm1, %v55_v8  ;;  %v1922_v29 = vpack.c.bf16 %v285_v28, %v284_v27  ;;  %v672_v32 = vld [vmem:[#allocation2 + $0xa8] sm:$0xff]  ;;  %v673_v34 = vld [vmem:[#allocation2 + $0xb0] sm:$0xff]  ;;  %v674_v35 = vld [vmem:[#allocation2 + $0xb8] sm:$0xff]  ;;  %p2051_p12 = pnand %p2050_p11, %p2044_p8 }
  0x1d   :  { %v1949_v33 = vpack.c.bf16 %v672_v32, %v671_v31  ;;  %v1952_v36 = vpack.c.bf16 %v674_v35, %v673_v34  ;;  %v2210_v37 = vld [vmem:[%s2340_s2] ss:$0 sm:$0xff]  ;;  %v278_v39 = vld [vmem:[#allocation2 + $0x8] sm:$0xff]  ;;  %v279_v45 = vld [vmem:[#allocation2 + $0x10] sm:$0xff] }
  0x1e   :  { %1923 = vmatpush3.bf16.msra.mxu1 %v1922_v29  ;;  %v277_v38 = vld [vmem:[#allocation2] sm:$0xff]  ;;  %v280_v46 = vld [vmem:[#allocation2 + $0x18] sm:$0xff]  ;;  %v435_v52 = vld [vmem:[#allocation2 + $0x48] sm:$0xff] }
  0x1f   :  { %1709 = vmatpush3.msk.msra.mxu0 %vm112_vm1, %v55_v8  ;;  %1924 = vmatprep.subr.bf16.mxu1 %v2072_v0  ;;  %v1925_v43 = vpack.c.bf16 %v278_v39, %v277_v38  ;;  %v1928_v49 = vpack.c.bf16 %v280_v46, %v279_v45  ;;  %v434_v51 = vld [vmem:[#allocation2 + $0x40] sm:$0xff]  ;;  %v830_v55 = vld [vmem:[#allocation2 + $0xe8] sm:$0xff]  ;;  %v436_v60 = vld [vmem:[#allocation2 + $0x50] sm:$0xff] }
  0x20   :  { %1711 = vmatmul.mubr.msk.f32.vlgmr.msra.gmra.mrb[0].mxu0 %vm63_vm0, %v36_v12  ;;  %1948 = vmatprep.subr.bf16.mxu0 %v2072_v0  ;;  %v829_v54 = vld [vmem:[#allocation2 + $0xe0] sm:$0xff]  ;;  %v1931_v58 = vpack.c.bf16 %v435_v52, %v434_v51  ;;  %v437_v61 = vld [vmem:[#allocation2 + $0x58] sm:$0xff]  ;;  %v831_v2 = vld [vmem:[#allocation2 + $0xf0] sm:$0xff] }
  0x21   :  { %1713 = vmatprep.mubr.msk.f32.mxu0 %vm63_vm0, %v37_v13  ;;  %1950 = vmatpush3.bf16.msra.mxu0 %v1949_v33  ;;  %v1961_v63 = vpack.c.bf16 %v830_v55, %v829_v54  ;;  %v832_v3 = vld [vmem:[#allocation2 + $0xf8] sm:$0xff]  ;;  %v1934_v6 = vpack.c.bf16 %v437_v61, %v436_v60  ;;  %v513_v7 = vld [vmem:[#allocation2 + $0x60] sm:$0xff]  ;;  %v514_v8 = vld [vmem:[#allocation2 + $0x68] sm:$0xff] }
  0x22   :  { %1951 = vmatprep.subr.bf16.mxu0 %v2072_v0  ;;  %v1964_v10 = vpack.c.bf16 %v832_v3, %v831_v2  ;;  %v987_v13 = vld [vmem:[#allocation2 + $0x120] sm:$0xff]  ;;  %v593_v28 = vld [vmem:[#allocation2 + $0x88] sm:$0xff]  ;;  %v1147_v46 = vld [vmem:[#allocation2 + $0x170] sm:$0xff] }
  0x23   :  { %v592_v27 = vld [vmem:[#allocation2 + $0x80] sm:$0xff]  ;;  %v1146_v34 = vld [vmem:[#allocation2 + $0x168] sm:$0xff]  ;;  %v753_v60 = vld [vmem:[#allocation2 + $0xd8] sm:$0xff] }
  0x24   :  { %1714 = vmatmul.mubr.msk.f32.gmra.mrb[2].mxu0 %vm63_vm0, %v38_v14  ;;  %v988_v14 = vld [vmem:[#allocation2 + $0x128] sm:$0xff]  ;;  %v1145_v33 = vld [vmem:[#allocation2 + $0x160] sm:$0xff]  ;;  %v1306_v2 = vld [vmem:[#allocation2 + $0x1b8] sm:$0xff] }
  0x25   :  { %1716 = vmatprep.mubr.msk.f32.mxu0 %vm63_vm0, %v39_v15  ;;  %1953 = vmatpush3.bf16.msra.mxu0 %v1952_v36  ;;  %v1943_v36 = vpack.c.bf16 %v593_v28, %v592_v27  ;;  %v750_v51 = vld [vmem:[#allocation2 + $0xc0] sm:$0xff]  ;;  %v751_v52 = vld [vmem:[#allocation2 + $0xc8] sm:$0xff]  ;;  %v1068_v27 = vld [vmem:[#allocation2 + $0x150] sm:$0xff] }
  0x26   :  { %1960 = vmatprep.subr.bf16.mxu0 %v2072_v0  ;;  %v1069_v28 = vld [vmem:[#allocation2 + $0x158] sm:$0xff] }
  0x28   :  { %1717 = vmatmul.mubr.msk.f32.gmra.mrb[4].mxu0 %vm63_vm0, %v40_v16  ;;  %v1937_v16 = vpack.c.bf16 %v514_v8, %v513_v7 }
  0x29   :  { %1719 = vmatprep.mubr.msk.f32.mxu0 %vm63_vm0, %v41_v17  ;;  %v515_v17 = vld [vmem:[#allocation2 + $0x70] sm:$0xff] }
  0x2c   :  { %1720 = vmatmul.mubr.msk.f32.gmra.mrb[6].mxu0 %vm63_vm0, %v42_v18  ;;  %v516_v18 = vld [vmem:[#allocation2 + $0x78] sm:$0xff] }
  0x2d   :  { %1722 = vmatprep.mubr.msk.f32.mxu0 %vm63_vm0, %v43_v19 }
  0x30   :  { %1723 = vmatmul.mubr.msk.f32.gmra.mrb[8].mxu0 %vm63_vm0, %v44_v20  ;;  %v1973_v20 = vpack.c.bf16 %v988_v14, %v987_v13  ;;  %v911_v13 = vld [vmem:[#allocation2 + $0x118] sm:$0xff] }
  0x31   :  { %1725 = vmatprep.mubr.msk.f32.mxu0 %vm63_vm0, %v45_v21 }
  0x34   :  { %1726 = vmatmul.mubr.msk.f32.gmra.mrb[10].mxu0 %vm63_vm0, %v46_v22  ;;  %v989_v22 = vld [vmem:[#allocation2 + $0x130] sm:$0xff] }
  0x35   :  { %1728 = vmatprep.mubr.msk.f32.mxu0 %vm63_vm0, %v47_v23  ;;  %v990_v23 = vld [vmem:[#allocation2 + $0x138] sm:$0xff] }
  0x36   :  { %v1976_v31 = vpack.c.bf16 %v990_v23, %v989_v22  ;;  %v1067_v22 = vld [vmem:[#allocation2 + $0x148] sm:$0xff] }
  0x38   :  { %1729 = vmatmul.mubr.msk.f32.gmra.mrb[12].mxu0 %vm63_vm0, %v48_v24 }
  0x39   :  { %1731 = vmatprep.mubr.msk.f32.mxu0 %vm63_vm0, %v49_v25  ;;  %v1940_v25 = vpack.c.bf16 %v516_v18, %v515_v17  ;;  %v1463_v18 = vld [vmem:[#allocation2 + $0x1f0] sm:$0xff] }
  0x3c   :  { %1732 = vmatmul.mubr.msk.f32.gmra.mrb[14].mxu0 %vm63_vm0, %v50_v26 }
  0x3d   :  { %1797 = vmatprep.mubr.msk.f32.mxu0 %vm2073_vm2, %v2074_v30 }
  0xf3   :  { %v1712_v40 = vpop.f32.mrb[0].mxu0 }
  0xf4   :  { %v188_v41 = vadd.f32 %v1712_v40, %v2210_v37  ;;  %v182_v42 = vpop.f32.mrb[1].mxu0  ;;  %v594_v40 = vld [vmem:[#allocation2 + $0x90] sm:$0xff] }
  0xf5   :  { %v183_v50 = vadd.f32 %v2210_v37, %v182_v42 }
  0xf6   :  { %v262_v44 = vmax.f32 %v188_v41, 0.0  ;;  %v595_v41 = vld [vmem:[#allocation2 + $0x98] sm:$0xff] }
  0xf7   :  { %v2213_v47 = vpop.f32.mrb[2].mxu0  ;;  %v261_v59 = vmax.f32 %v183_v50, 0.0 }
  0xf8   :  { %1743 = vmatmul.mubr.msk.f32.vlgmr.msra.gmra.mrb[0].mxu1 %vm286_vm3, %v262_v44  ;;  %v192_v48 = vpop.f32.mrb[3].mxu0  ;;  %v198_v26 = vadd.f32 %v2213_v47, %v2210_v37  ;;  %v1148_v47 = vld [vmem:[#allocation2 + $0x178] sm:$0xff] }
  0xf9   :  { %1926 = vmatpush3.bf16.msra.mxu1 %v1925_v43  ;;  %1753 = vmatprep.mubr.msk.f32.mxu1 %vm2073_vm2, %v2074_v30  ;;  %v193_v4 = vadd.f32 %v2210_v37, %v192_v48  ;;  %v1985_v43 = vpack.c.bf16 %v1146_v34, %v1145_v33  ;;  %v1988_v54 = vpack.c.bf16 %v1148_v47, %v1147_v46  ;;  %v1224_v33 = vld [vmem:[#allocation2 + $0x180] sm:$0xff]  ;;  %v1225_v34 = vld [vmem:[#allocation2 + $0x188] sm:$0xff] }
  0xfa   :  { %1927 = vmatprep.subr.bf16.mxu1 %v2072_v0  ;;  %v264_v39 = vmax.f32 %v198_v26, 0.0 }
  0xfb   :  { %v1718_v53 = vpop.f32.mrb[4].mxu0  ;;  %v263_v12 = vmax.f32 %v193_v4, 0.0  ;;  %v908_v4 = vld [vmem:[#allocation2 + $0x100] sm:$0xff] }
  0xfc   :  { %v208_v56 = vadd.f32 %v1718_v53, %v2210_v37  ;;  %v2221_v57 = vpop.f32.mrb[5].mxu0 }
  0xfd   :  { %1929 = vmatpush3.bf16.msra.mxu1 %v1928_v49  ;;  %v203_v45 = vadd.f32 %v2210_v37, %v2221_v57  ;;  %v1946_v49 = vpack.c.bf16 %v595_v41, %v594_v40  ;;  %v1304_v57 = vld [vmem:[#allocation2 + $0x1a8] sm:$0xff]  ;;  %v1227_v40 = vld [vmem:[#allocation2 + $0x198] sm:$0xff] }
  0xfe   :  { %1930 = vmatprep.subr.bf16.mxu1 %v2072_v0  ;;  %v266_v62 = vmax.f32 %v208_v56, 0.0  ;;  %v1303_v56 = vld [vmem:[#allocation2 + $0x1a0] sm:$0xff]  ;;  %v1383_v41 = vld [vmem:[#allocation2 + $0x1c8] sm:$0xff] }
  0xff   :  { %v1721_v1 = vpop.f32.mrb[6].mxu0  ;;  %v265_v55 = vmax.f32 %v203_v45, 0.0  ;;  %v1385_v45 = vld [vmem:[#allocation2 + $0x1d8] sm:$0xff] }
 0x100   :  { %1754 = vmatmul.mubr.msk.f32.vlgmr.msra.gmra.mrb[2].mxu1 %vm286_vm3, %v261_v59  ;;  %1798 = vmatmul.mubr.msk.f32.vlgmr.msra.gmra.mrb[16].mxu0 %vm286_vm3, %v266_v62  ;;  %v2227_v5 = vpop.f32.mrb[7].mxu0  ;;  %v218_v9 = vadd.f32 %v1721_v1, %v2210_v37  ;;  %v752_v59 = vld [vmem:[#allocation2 + $0xd0] sm:$0xff]  ;;  %v1997_v62 = vpack.c.bf16 %v1304_v57, %v1303_v56 }
 0x101   :  { %1932 = vmatpush3.bf16.msra.mxu1 %v1931_v58  ;;  %1764 = vmatprep.mubr.msk.f32.mxu1 %vm2073_vm2, %v2074_v30  ;;  %v1955_v58 = vpack.c.bf16 %v751_v52, %v750_v51  ;;  %v1305_v1 = vld [vmem:[#allocation2 + $0x1b0] sm:$0xff]  ;;  %v1958_v3 = vpack.c.bf16 %v753_v60, %v752_v59 }
 0x102   :  { %1933 = vmatprep.subr.bf16.mxu1 %v2072_v0  ;;  %1962 = vmatpush3.bf16.msra.mxu0 %v1961_v63  ;;  %v268_v19 = vmax.f32 %v218_v9, 0.0  ;;  %v213_v63 = vadd.f32 %v2210_v37, %v2227_v5  ;;  %v2000_v8 = vpack.c.bf16 %v1306_v2, %v1305_v1  ;;  %v1461_v9 = vld [vmem:[#allocation2 + $0x1e0] sm:$0xff] }
 0x103   :  { %1963 = vmatprep.subr.bf16.mxu0 %v2072_v0  ;;  %1819 = vmatprep.mubr.msk.f32.mxu0 %vm2073_vm2, %v2074_v30  ;;  %v1724_v11 = vpop.f32.mrb[8].mxu0 }
 0x104   :  { %v2236_v15 = vpop.f32.mrb[9].mxu0  ;;  %v228_v29 = vadd.f32 %v1724_v11, %v2210_v37  ;;  %v267_v5 = vmax.f32 %v213_v63, 0.0 }
 0x105   :  { %1935 = vmatpush3.bf16.msra.mxu1 %v1934_v6  ;;  %v909_v6 = vld [vmem:[#allocation2 + $0x108] sm:$0xff]  ;;  %v223_v17 = vadd.f32 %v2210_v37, %v2236_v15 }
 0x106   :  { %1936 = vmatprep.subr.bf16.mxu1 %v2072_v0  ;;  %1965 = vmatpush3.bf16.msra.mxu0 %v1964_v10  ;;  %v270_v42 = vmax.f32 %v228_v29, 0.0  ;;  %v1462_v10 = vld [vmem:[#allocation2 + $0x1e8] sm:$0xff]  ;;  %v1967_v11 = vpack.c.bf16 %v909_v6, %v908_v4 }
 0x107   :  { %1972 = vmatprep.subr.bf16.mxu0 %v2072_v0  ;;  %v1727_v21 = vpop.f32.mrb[10].mxu0 }
 0x108   :  { %1765 = vmatmul.mubr.msk.f32.vlgmr.msra.gmra.mrb[4].mxu1 %vm286_vm3, %v263_v12  ;;  %v2241_v24 = vpop.f32.mrb[11].mxu0  ;;  %v238_v53 = vadd.f32 %v1727_v21, %v2210_v37  ;;  %v910_v12 = vld [vmem:[#allocation2 + $0x110] sm:$0xff]  ;;  %v1066_v21 = vld [vmem:[#allocation2 + $0x140] sm:$0xff] }
 0x109   :  { %1938 = vmatpush3.bf16.msra.mxu1 %v1937_v16  ;;  %1775 = vmatprep.mubr.msk.f32.mxu1 %vm2073_vm2, %v2074_v30  ;;  %v2009_v16 = vpack.c.bf16 %v1462_v10, %v1461_v9  ;;  %v1979_v26 = vpack.c.bf16 %v1067_v22, %v1066_v21 }
 0x10a   :  { %1939 = vmatprep.subr.bf16.mxu1 %v2072_v0  ;;  %1820 = vmatmul.mubr.msk.f32.vlgmr.msra.gmra.mrb[18].mxu0 %vm286_vm3, %v268_v19  ;;  %v272_v61 = vmax.f32 %v238_v53, 0.0  ;;  %v1464_v19 = vld [vmem:[#allocation2 + $0x1f8] sm:$0xff] }
 0x10b   :  { %1974 = vmatpush3.bf16.msra.mxu0 %v1973_v20  ;;  %1841 = vmatprep.mubr.msk.f32.mxu0 %vm2073_vm2, %v2074_v30  ;;  %v1730_v32 = vpop.f32.mrb[12].mxu0  ;;  %v1970_v20 = vpack.c.bf16 %v911_v13, %v910_v12  ;;  %v2012_v15 = vpack.c.bf16 %v1464_v19, %v1463_v18 }
 0x10c   :  { %1975 = vmatprep.subr.bf16.mxu0 %v2072_v0  ;;  %v242_v35 = vpop.f32.mrb[13].mxu0  ;;  %v248_v7 = vadd.f32 %v1730_v32, %v2210_v37  ;;  %v1982_v32 = vpack.c.bf16 %v1069_v28, %v1068_v27 }
 0x10d   :  { %1941 = vmatpush3.bf16.msra.mxu1 %v1940_v25  ;;  %v2254_v38 = vadd.f32 %v2210_v37, %v242_v35  ;;  %v269_v25 = vmax.f32 %v223_v17, 0.0 }
 0x10e   :  { %1942 = vmatprep.subr.bf16.mxu1 %v2072_v0  ;;  %v274_v14 = vmax.f32 %v248_v7, 0.0 }
 0x10f   :  { %1977 = vmatpush3.bf16.msra.mxu0 %v1976_v31  ;;  %v2257_v44 = vpop.f32.mrb[14].mxu0  ;;  %v233_v31 = vadd.f32 %v2210_v37, %v2241_v24  ;;  %v1382_v24 = vld [vmem:[#allocation2 + $0x1c0] sm:$0xff] }
 0x110   :  { %1776 = vmatmul.mubr.msk.f32.vlgmr.msra.gmra.mrb[6].mxu1 %vm286_vm3, %v264_v39  ;;  %1984 = vmatprep.subr.bf16.mxu0 %v2072_v0  ;;  %v252_v48 = vpop.f32.mrb[15].mxu0  ;;  %v258_v23 = vadd.f32 %v2257_v44, %v2210_v37  ;;  %v1226_v39 = vld [vmem:[#allocation2 + $0x190] sm:$0xff] }
 0x111   :  { %1944 = vmatpush3.bf16.msra.mxu1 %v1943_v36  ;;  %1786 = vmatprep.mubr.msk.f32.mxu1 %vm2073_vm2, %v2074_v30  ;;  %v2266_v50 = vadd.f32 %v2210_v37, %v252_v48  ;;  %v271_v35 = vmax.f32 %v233_v31, 0.0  ;;  %v1991_v36 = vpack.c.bf16 %v1225_v34, %v1224_v33  ;;  %v1994_v37 = vpack.c.bf16 %v1227_v40, %v1226_v39  ;;  %v1384_v44 = vld [vmem:[#allocation2 + $0x1d0] sm:$0xff] }
 0x112   :  { %1945 = vmatprep.subr.bf16.mxu1 %v2072_v0  ;;  %1842 = vmatmul.mubr.msk.f32.vlgmr.msra.gmra.mrb[20].mxu0 %vm286_vm3, %v270_v42  ;;  %v276_v29 = vmax.f32 %v258_v23, 0.0  ;;  %v273_v42 = vmax.f32 %v2254_v38, 0.0  ;;  %v2006_v46 = vpack.c.bf16 %v1385_v45, %v1384_v44 }
 0x113   :  { %1986 = vmatpush3.bf16.msra.mxu0 %v1985_v43  ;;  %1863 = vmatprep.mubr.msk.f32.mxu0 %vm2073_vm2, %v2074_v30  ;;  %v2003_v43 = vpack.c.bf16 %v1383_v41, %v1382_v24  ;;  %v275_v47 = vmax.f32 %v2266_v50, 0.0 }
 0x114   :  { %1987 = vmatprep.subr.bf16.mxu0 %v2072_v0 }
 0x115   :  { %1947 = vmatpush3.bf16.msra.mxu1 %v1946_v49 }
 0x116   :  { %1954 = vmatprep.subr.bf16.mxu1 %v2072_v0 }
 0x117   :  { %1989 = vmatpush3.bf16.msra.mxu0 %v1988_v54 }
 0x118   :  { %1787 = vmatmul.mubr.msk.f32.vlgmr.msra.gmra.mrb[8].mxu1 %vm286_vm3, %v265_v55  ;;  %1996 = vmatprep.subr.bf16.mxu0 %v2072_v0 }
 0x119   :  { %1956 = vmatpush3.bf16.msra.mxu1 %v1955_v58  ;;  %1808 = vmatprep.mubr.msk.f32.mxu1 %vm2073_vm2, %v2074_v30 }
 0x11a   :  { %1957 = vmatprep.subr.bf16.mxu1 %v2072_v0  ;;  %1864 = vmatmul.mubr.msk.f32.vlgmr.msra.gmra.mrb[22].mxu0 %vm286_vm3, %v272_v61 }
 0x11b   :  { %1998 = vmatpush3.bf16.msra.mxu0 %v1997_v62  ;;  %1885 = vmatprep.mubr.msk.f32.mxu0 %vm2073_vm2, %v2074_v30 }
 0x11c   :  { %1999 = vmatprep.subr.bf16.mxu0 %v2072_v0 }
 0x11d   :  { %1959 = vmatpush3.bf16.msra.mxu1 %v1958_v3 }
 0x11e   :  { %1966 = vmatprep.subr.bf16.mxu1 %v2072_v0 }
 0x11f   :  { %2001 = vmatpush3.bf16.msra.mxu0 %v2000_v8 }
 0x120   :  { %1809 = vmatmul.mubr.msk.f32.vlgmr.msra.gmra.mrb[10].mxu1 %vm286_vm3, %v267_v5  ;;  %2008 = vmatprep.subr.bf16.mxu0 %v2072_v0 }
 0x121   :  { %1968 = vmatpush3.bf16.msra.mxu1 %v1967_v11  ;;  %1830 = vmatprep.mubr.msk.f32.mxu1 %vm2073_vm2, %v2074_v30 }
 0x122   :  { %1969 = vmatprep.subr.bf16.mxu1 %v2072_v0  ;;  %1886 = vmatmul.mubr.msk.f32.vlgmr.msra.gmra.mrb[24].mxu0 %vm286_vm3, %v274_v14 }
 0x123   :  { %2010 = vmatpush3.bf16.msra.mxu0 %v2009_v16  ;;  %1907 = vmatprep.mubr.msk.f32.mxu0 %vm2073_vm2, %v2074_v30 }
 0x124   :  { %2011 = vmatprep.subr.bf16.mxu0 %v2072_v0 }
 0x125   :  { %1971 = vmatpush3.bf16.msra.mxu1 %v1970_v20 }
 0x126   :  { %1978 = vmatprep.subr.bf16.mxu1 %v2072_v0 }
 0x127   :  { %2013 = vmatpush3.bf16.msra.mxu0 %v2012_v15 }
 0x128   :  { %1831 = vmatmul.mubr.msk.f32.vlgmr.msra.gmra.mrb[12].mxu1 %vm286_vm3, %v269_v25 }
 0x129   :  { %1980 = vmatpush3.bf16.msra.mxu1 %v1979_v26  ;;  %1852 = vmatprep.mubr.msk.f32.mxu1 %vm2073_vm2, %v2074_v30 }
 0x12a   :  { %1981 = vmatprep.subr.bf16.mxu1 %v2072_v0  ;;  %1908 = vmatmul.mubr.msk.f32.vlgmr.msra.gmra.mrb[26].mxu0 %vm286_vm3, %v276_v29  ;;  %v1598_v29 = vld [vmem:[%s2342_s4] ss:$0 sm:$0xff] }
 0x12d   :  { %1983 = vmatpush3.bf16.msra.mxu1 %v1982_v32 }
 0x12e   :  { %1990 = vmatprep.subr.bf16.mxu1 %v2072_v0 }
 0x130   :  { %1853 = vmatmul.mubr.msk.f32.vlgmr.msra.gmra.mrb[14].mxu1 %vm286_vm3, %v271_v35 }
 0x131   :  { %1992 = vmatpush3.bf16.msra.mxu1 %v1991_v36  ;;  %1874 = vmatprep.mubr.msk.f32.mxu1 %vm2073_vm2, %v2074_v30 }
 0x132   :  { %1993 = vmatprep.subr.bf16.mxu1 %v2072_v0 }
 0x135   :  { %1995 = vmatpush3.bf16.msra.mxu1 %v1994_v37 }
 0x136   :  { %2002 = vmatprep.subr.bf16.mxu1 %v2072_v0 }
 0x138   :  { %1875 = vmatmul.mubr.msk.f32.vlgmr.msra.gmra.mrb[16].mxu1 %vm286_vm3, %v273_v42 }
 0x139   :  { %2004 = vmatpush3.bf16.msra.mxu1 %v2003_v43  ;;  %1896 = vmatprep.mubr.msk.f32.mxu1 %vm2073_vm2, %v2074_v30 }
 0x13a   :  { %2005 = vmatprep.subr.bf16.mxu1 %v2072_v0 }
 0x13d   :  { %2007 = vmatpush3.bf16.msra.mxu1 %v2006_v46 }
 0x140   :  { %1897 = vmatmul.mubr.msk.f32.vlgmr.msra.gmra.mrb[18].mxu1 %vm286_vm3, %v275_v47 }
 0x1cb   :  { %v356_v38 = vpop.f32.mrb[0].mxu1 }
 0x1cc   :  { %v1744_v48 = vpop.f32.mrb[1].mxu1 }
 0x1d3   :  { %v429_v49 = vpop.f32.mrb[2].mxu1  ;;  %v744_v51 = vpop.f32.mrb[16].mxu0 }
 0x1d4   :  { %v430_v52 = vadd.f32 %v429_v49, %v356_v38  ;;  %v1755_v53 = vpop.f32.mrb[3].mxu1  ;;  %v1799_v54 = vpop.f32.mrb[17].mxu0 }
 0x1db   :  { %v507_v55 = vpop.f32.mrb[4].mxu1 }
 0x1dc   :  { %v511_v56 = vadd.f32 %v507_v55, %v430_v52  ;;  %v1766_v57 = vpop.f32.mrb[5].mxu1 }
 0x1dd   :  { %v902_v58 = vpop.f32.mrb[18].mxu0 }
 0x1de   :  { %v1821_v59 = vpop.f32.mrb[19].mxu0 }
 0x1e3   :  { %v586_v30 = vpop.f32.mrb[6].mxu1 }
 0x1e4   :  { %v590_v60 = vadd.f32 %v586_v30, %v511_v56  ;;  %v1777_v0 = vpop.f32.mrb[7].mxu1 }
 0x1e5   :  { %v1060_v61 = vpop.f32.mrb[20].mxu0 }
 0x1e6   :  { %v1843_v50 = vpop.f32.mrb[21].mxu0 }
 0x1eb   :  { %v665_v62 = vpop.f32.mrb[8].mxu1 }
 0x1ec   :  { %v669_v63 = vadd.f32 %v665_v62, %v590_v60  ;;  %v1788_v1 = vpop.f32.mrb[9].mxu1 }
 0x1ed   :  { %v1218_v2 = vpop.f32.mrb[22].mxu0 }
 0x1ee   :  { %v748_v3 = vadd.f32 %v744_v51, %v669_v63  ;;  %v1865_v4 = vpop.f32.mrb[23].mxu0 }
 0x1f3   :  { %v823_v6 = vpop.f32.mrb[10].mxu1 }
 0x1f4   :  { %v827_v7 = vadd.f32 %v823_v6, %v748_v3  ;;  %v1810_v8 = vpop.f32.mrb[11].mxu1 }
 0x1f5   :  { %v1376_v5 = vpop.f32.mrb[24].mxu0 }
 0x1f6   :  { %v906_v9 = vadd.f32 %v902_v58, %v827_v7  ;;  %v1887_v10 = vpop.f32.mrb[25].mxu0 }
 0x1fb   :  { %v981_v11 = vpop.f32.mrb[12].mxu1 }
 0x1fc   :  { %v985_v12 = vadd.f32 %v981_v11, %v906_v9  ;;  %v1832_v13 = vpop.f32.mrb[13].mxu1 }
 0x1fd   :  { %v1534_v14 = vpop.f32.mrb[26].mxu0 }
 0x1fe   :  { %v1064_v16 = vadd.f32 %v1060_v61, %v985_v12  ;;  %v1909_v17 = vpop.f32.mrb[27].mxu0 }
 0x203   :  { %v1139_v18 = vpop.f32.mrb[14].mxu1 }
 0x204   :  { %v1143_v19 = vadd.f32 %v1139_v18, %v1064_v16  ;;  %v1854_v20 = vpop.f32.mrb[15].mxu1 }
 0x206   :  { %v1222_v21 = vadd.f32 %v1218_v2, %v1143_v19 }
 0x20b   :  { %v1297_v22 = vpop.f32.mrb[16].mxu1 }
 0x20c   :  { %v1301_v23 = vadd.f32 %v1297_v22, %v1222_v21  ;;  %v1876_v15 = vpop.f32.mrb[17].mxu1 }
 0x20e   :  { %v1380_v25 = vadd.f32 %v1376_v5, %v1301_v23 }
 0x213   :  { %v1455_v26 = vpop.f32.mrb[18].mxu1 }
 0x214   :  { %v1459_v27 = vadd.f32 %v1455_v26, %v1380_v25  ;;  %v1898_v28 = vpop.f32.mrb[19].mxu1 }
 0x216   :  { %v1538_v31 = vadd.f32 %v1534_v14, %v1459_v27 }
 0x218   :  { %v1546_v32 = vadd.f32 %v1598_v29, %v1538_v31 }
 0x21a   :  { %v1547_v33 = vmax.f32 %v1546_v32, 0.0 }
 0x21c   :  { %1548 = vst.msk [vmem:[#allocation5] sm:$0xff] %vm286_vm3, %v1547_v33 }
 0x21d   :  { %2054 = shalt.err (!%p2051_p12)
}
 0x21e   :  { %s2055_s27 = scalar_lea.hbm %s2343_s5, 128 }
 0x21f   :  { %p2056_p13 = scmp.ne.s32.totalorder %s2343_s5, %s2055_s27  ;;  %p2059_p0 = scmp.lt.u32.totalorder %s2055_s27, %s2343_s5 }
 0x221   :  { %p2061_p1 = pnand %p2059_p0, %p2056_p13 }
 0x223   :  { %2064 = shalt.err (!%p2061_p1)
}
 0x224   :  { %1558 = dma.vmem_to_hbm [thread:$0]  %s1556_s23, 128, %s2343_s5, [#allocation4]  }
 0x225   :  { %2067 = dma.done.wait [#allocation4], 128  }
 0x226   :  { %2068 = vsyncadd [#allocation4], 4294967168 }
 0x227   :  { %1562 = vsyncpa [#allocation3], 1 }
 0x228   :  { %1563 = vsyncpa [#allocation4], 1 }

</bundles_post_ra>
